<compile_context>
chip_gen: v5e
topology: v5e:2x2
jax: 0.10.0
libtpu: 0.0.40
codegen_flags: <defaults>
</compile_context>

<pallas_src>
import math

import jax
import jax.numpy as jnp
from jax.experimental import pallas as pl
from jax.experimental.pallas import tpu as pltpu


def value_net_kernel(xT_ref, w1_ref, b1_ref, w2_ref, b2_ref, w3_ref, b3_ref, out_ref):
    # xT_ref: (state_dim, TB) -- batch on the 128-lane axis.  All math exact f32 on VPU/XLU.
    x = xT_ref[...]                                   # (state_dim, TB)
    state_dim = x.shape[0]
    tb = x.shape[1]
    hidden = w1_ref.shape[0]                          # 16

    w1 = w1_ref[...]                                  # (16, state_dim)
    w2 = w2_ref[...]                                  # (16, 16)
    w3 = w3_ref[...]                                  # (16, 1)

    # fc1 + ReLU:  h1[o, b] = sum_k w1[o, k] * x[k, b] + b1[o]
    # Exact f32 via broadcast-FMAs (lane-broadcast of w1 column, sublane-broadcast of x row).
    h1 = jnp.broadcast_to(b1_ref[...], (hidden, tb))
    for k in range(state_dim):                        # static unroll, state_dim = 4
        h1 = h1 + w1[:, k:k + 1] * x[k:k + 1, :]
    h1 = jnp.maximum(h1, 0.0)

    # fc2 + ReLU:  same structure, K = 16.  Still far cheaper than the multi-pass f32 MXU
    # path and exactly reproducible against the f32 reference.
    h2 = jnp.broadcast_to(b2_ref[...], (hidden, tb))
    for j in range(hidden):                           # static unroll, 16 FMAs on (16, TB)
        h2 = h2 + w2[:, j:j + 1] * h1[j:j + 1, :]
    h2 = jnp.maximum(h2, 0.0)

    # fc3 (out_features == 1): VPU multiply + XLU sublane reduce -> lane-dense (1, TB) store.
    out_ref[...] = jnp.sum(w3 * h2, axis=0, keepdims=True) + b3_ref[...]


def _round_up(x: int, m: int) -> int:
    return ((x + m - 1) // m) * m


def _cdiv(a: int, b: int) -> int:
    return -(-a // b)


def value_network_forward(state, params, *, max_tile_batch: int = 32768):
    """state: [batch, state_dim] float32 -> value: [batch, 1] float32."""
    w1, b1, w2, b2, w3c, b3 = params
    batch, state_dim = state.shape

    # Tile selection that minimizes tail padding (< 128 rows per tile):
    #   n_tiles = cdiv(batch, cap); tb = round_up(cdiv(batch, n_tiles), 128).
    n_tiles = max(1, _cdiv(batch, max_tile_batch))
    tb = _round_up(_cdiv(batch, n_tiles), 128)
    batch_p = n_tiles * tb

    # Batch-on-lanes layout.  Under jit the pad+transpose fuse into one copy; padded lanes
    # produce finite ReLU(bias) garbage that is sliced off below (never reduced in-kernel).
    xT = jnp.transpose(state)                         # (state_dim, batch)
    if batch_p != batch:
        xT = jnp.pad(xT, ((0, 0), (0, batch_p - batch)))

    resident = lambda shape: pl.BlockSpec(shape, lambda i: (0, 0))  # stays in VMEM across tiles

    out = pl.pallas_call(
        value_net_kernel,
        out_shape=jax.ShapeDtypeStruct((1, batch_p), jnp.float32),
        grid=(n_tiles,),
        in_specs=[
            pl.BlockSpec((state_dim, tb), lambda i: (0, i)),   # state tile, double-buffered
            resident(w1.shape), resident(b1.shape),
            resident(w2.shape), resident(b2.shape),
            resident(w3c.shape), resident(b3.shape),
        ],
        out_specs=pl.BlockSpec((1, tb), lambda i: (0, i)),     # lane-dense output tile
        compiler_params=pltpu.CompilerParams(
            dimension_semantics=("parallel",),                 # let v7x's 2 TCs split tiles
        ),
    )(xT, w1, b1, w2, b2, w3c, b3)

    return out[0, :batch][:, None]                             # (batch, 1)


def init_params(key, state_dim: int):
    """PyTorch nn.Linear default init: U(-1/sqrt(fan_in), 1/sqrt(fan_in)) for weight and bias.

    Weights stored (out, in) like PyTorch; biases as (out, 1) so they broadcast over lanes.
    fc3's weight is returned as a (16, 1) column so the kernel uses a VPU multiply + reduce.
    """
    def linear(k, fan_in, fan_out):
        kw, kb = jax.random.split(k)
        bound = 1.0 / math.sqrt(fan_in)
        w = jax.random.uniform(kw, (fan_out, fan_in), jnp.float32, -bound, bound)
        b = jax.random.uniform(kb, (fan_out, 1), jnp.float32, -bound, bound)
        return w, b

    k1, k2, k3 = jax.random.split(key, 3)
    w1, b1 = linear(k1, state_dim, 16)
    w2, b2 = linear(k2, 16, 16)
    w3, b3 = linear(k3, 16, 1)
    return (w1, b1, w2, b2, w3.T, b3)   # w3.T: (16, 1) column


def reference_forward(state, params):
    """Pure-JAX reference in exact f32 (broadcast-multiply-sum, no TPU dot precision quirks)."""
    w1, b1, w2, b2, w3c, b3 = params
    h1 = jnp.maximum((state[:, None, :] * w1[None, :, :]).sum(-1) + b1[:, 0], 0.0)
    h2 = jnp.maximum((h1[:, None, :] * w2[None, :, :]).sum(-1) + b2[:, 0], 0.0)
    return (h2 * w3c[:, 0][None, :]).sum(-1, keepdims=True) + b3[0, 0]


if __name__ == "__main__":
    key = jax.random.PRNGKey(0)
    k_params, k_state = jax.random.split(key)

    state_dim = 4   # CartPole observation dim
    batch = 8       # tiny demo; the kernel is built to scale to 100K+ rows per call

    params = init_params(k_params, state_dim)
    state = jax.random.normal(k_state, (batch, state_dim), jnp.float32)

    fwd = jax.jit(value_network_forward)
    value = jax.block_until_ready(fwd(state, params))

    ref = reference_forward(state, params)
    assert value.shape == (batch, 1), value.shape
    assert jnp.allclose(value, ref, atol=1e-5, rtol=1e-5), (value, ref)

    print("KERNEL_OK")
</pallas_src>

<mosaic_0001>
module attributes {stable_mosaic.version = 11 : i64} {
  func.func @value_net_kernel(%arg0: i32, %arg1: memref<4x128xf32, #tpu.memory_space<vmem>>, %arg2: memref<16x4xf32, #tpu.memory_space<vmem>>, %arg3: memref<16x1xf32, #tpu.memory_space<vmem>>, %arg4: memref<16x16xf32, #tpu.memory_space<vmem>>, %arg5: memref<16x1xf32, #tpu.memory_space<vmem>>, %arg6: memref<16x1xf32, #tpu.memory_space<vmem>>, %arg7: memref<1x1xf32, #tpu.memory_space<vmem>>, %arg8: memref<1x128xf32, #tpu.memory_space<vmem>>) attributes {dimension_semantics = [#tpu.dimension_semantics<parallel>], iteration_bounds = array<i64: 1>, scalar_prefetch = 0 : i64, scratch_operands = 0 : i64, tpu.core_type = #tpu.core_type<tc>, window_params = [{transform_indices = @transform_0, window_bounds = array<i64: 4, 128>}, {pipeline_mode = #tpu.pipeline_mode<synchronous>, transform_indices = @transform_1, window_bounds = array<i64: 16, 4>}, {pipeline_mode = #tpu.pipeline_mode<synchronous>, transform_indices = @transform_2, window_bounds = array<i64: 16, 1>}, {pipeline_mode = #tpu.pipeline_mode<synchronous>, transform_indices = @transform_3, window_bounds = array<i64: 16, 16>}, {pipeline_mode = #tpu.pipeline_mode<synchronous>, transform_indices = @transform_4, window_bounds = array<i64: 16, 1>}, {pipeline_mode = #tpu.pipeline_mode<synchronous>, transform_indices = @transform_5, window_bounds = array<i64: 16, 1>}, {pipeline_mode = #tpu.pipeline_mode<synchronous>, transform_indices = @transform_6, window_bounds = array<i64: 1, 1>}, {transform_indices = @transform_7, window_bounds = array<i64: 1, 128>}]} {
    %c0 = arith.constant 0 : index
    %c0_0 = arith.constant 0 : index
    %0 = vector.load %arg1[%c0, %c0_0] : memref<4x128xf32, #tpu.memory_space<vmem>>, vector<4x128xf32>
    %c0_1 = arith.constant 0 : index
    %c0_2 = arith.constant 0 : index
    %1 = vector.load %arg2[%c0_1, %c0_2] : memref<16x4xf32, #tpu.memory_space<vmem>>, vector<16x4xf32>
    %c0_3 = arith.constant 0 : index
    %c0_4 = arith.constant 0 : index
    %2 = vector.load %arg4[%c0_3, %c0_4] : memref<16x16xf32, #tpu.memory_space<vmem>>, vector<16x16xf32>
    %c0_5 = arith.constant 0 : index
    %c0_6 = arith.constant 0 : index
    %3 = vector.load %arg6[%c0_5, %c0_6] : memref<16x1xf32, #tpu.memory_space<vmem>>, vector<16x1xf32>
    %c0_7 = arith.constant 0 : index
    %c0_8 = arith.constant 0 : index
    %4 = vector.load %arg3[%c0_7, %c0_8] : memref<16x1xf32, #tpu.memory_space<vmem>>, vector<16x1xf32>
    %5 = vector.shape_cast %4 : vector<16x1xf32> to vector<16x1xf32>
    %6 = vector.broadcast %5 : vector<16x1xf32> to vector<16x128xf32>
    %7 = vector.extract_strided_slice %1 {offsets = [0, 0], sizes = [16, 1], strides = [1, 1]} : vector<16x4xf32> to vector<16x1xf32>
    %8 = vector.extract_strided_slice %0 {offsets = [0, 0], sizes = [1, 128], strides = [1, 1]} : vector<4x128xf32> to vector<1x128xf32>
    %9 = vector.broadcast %7 : vector<16x1xf32> to vector<16x128xf32>
    %10 = vector.broadcast %8 : vector<1x128xf32> to vector<16x128xf32>
    %11 = arith.mulf %9, %10 : vector<16x128xf32>
    %12 = arith.addf %6, %11 : vector<16x128xf32>
    %13 = vector.extract_strided_slice %1 {offsets = [0, 1], sizes = [16, 1], strides = [1, 1]} : vector<16x4xf32> to vector<16x1xf32>
    %14 = vector.extract_strided_slice %0 {offsets = [1, 0], sizes = [1, 128], strides = [1, 1]} : vector<4x128xf32> to vector<1x128xf32>
    %15 = vector.broadcast %13 : vector<16x1xf32> to vector<16x128xf32>
    %16 = vector.broadcast %14 : vector<1x128xf32> to vector<16x128xf32>
    %17 = arith.mulf %15, %16 : vector<16x128xf32>
    %18 = arith.addf %12, %17 : vector<16x128xf32>
    %19 = vector.extract_strided_slice %1 {offsets = [0, 2], sizes = [16, 1], strides = [1, 1]} : vector<16x4xf32> to vector<16x1xf32>
    %20 = vector.extract_strided_slice %0 {offsets = [2, 0], sizes = [1, 128], strides = [1, 1]} : vector<4x128xf32> to vector<1x128xf32>
    %21 = vector.broadcast %19 : vector<16x1xf32> to vector<16x128xf32>
    %22 = vector.broadcast %20 : vector<1x128xf32> to vector<16x128xf32>
    %23 = arith.mulf %21, %22 : vector<16x128xf32>
    %24 = arith.addf %18, %23 : vector<16x128xf32>
    %25 = vector.extract_strided_slice %1 {offsets = [0, 3], sizes = [16, 1], strides = [1, 1]} : vector<16x4xf32> to vector<16x1xf32>
    %26 = vector.extract_strided_slice %0 {offsets = [3, 0], sizes = [1, 128], strides = [1, 1]} : vector<4x128xf32> to vector<1x128xf32>
    %27 = vector.broadcast %25 : vector<16x1xf32> to vector<16x128xf32>
    %28 = vector.broadcast %26 : vector<1x128xf32> to vector<16x128xf32>
    %29 = arith.mulf %27, %28 : vector<16x128xf32>
    %30 = arith.addf %24, %29 : vector<16x128xf32>
    %cst = arith.constant 0.000000e+00 : f32
    %31 = vector.broadcast %cst : f32 to vector<16x128xf32>
    %32 = arith.maximumf %30, %31 : vector<16x128xf32>
    %c0_9 = arith.constant 0 : index
    %c0_10 = arith.constant 0 : index
    %33 = vector.load %arg5[%c0_9, %c0_10] : memref<16x1xf32, #tpu.memory_space<vmem>>, vector<16x1xf32>
    %34 = vector.shape_cast %33 : vector<16x1xf32> to vector<16x1xf32>
    %35 = vector.broadcast %34 : vector<16x1xf32> to vector<16x128xf32>
    %36 = vector.extract_strided_slice %2 {offsets = [0, 0], sizes = [16, 1], strides = [1, 1]} : vector<16x16xf32> to vector<16x1xf32>
    %37 = vector.extract_strided_slice %32 {offsets = [0, 0], sizes = [1, 128], strides = [1, 1]} : vector<16x128xf32> to vector<1x128xf32>
    %38 = vector.broadcast %36 : vector<16x1xf32> to vector<16x128xf32>
    %39 = vector.broadcast %37 : vector<1x128xf32> to vector<16x128xf32>
    %40 = arith.mulf %38, %39 : vector<16x128xf32>
    %41 = arith.addf %35, %40 : vector<16x128xf32>
    %42 = vector.extract_strided_slice %2 {offsets = [0, 1], sizes = [16, 1], strides = [1, 1]} : vector<16x16xf32> to vector<16x1xf32>
    %43 = vector.extract_strided_slice %32 {offsets = [1, 0], sizes = [1, 128], strides = [1, 1]} : vector<16x128xf32> to vector<1x128xf32>
    %44 = vector.broadcast %42 : vector<16x1xf32> to vector<16x128xf32>
    %45 = vector.broadcast %43 : vector<1x128xf32> to vector<16x128xf32>
    %46 = arith.mulf %44, %45 : vector<16x128xf32>
    %47 = arith.addf %41, %46 : vector<16x128xf32>
    %48 = vector.extract_strided_slice %2 {offsets = [0, 2], sizes = [16, 1], strides = [1, 1]} : vector<16x16xf32> to vector<16x1xf32>
    %49 = vector.extract_strided_slice %32 {offsets = [2, 0], sizes = [1, 128], strides = [1, 1]} : vector<16x128xf32> to vector<1x128xf32>
    %50 = vector.broadcast %48 : vector<16x1xf32> to vector<16x128xf32>
    %51 = vector.broadcast %49 : vector<1x128xf32> to vector<16x128xf32>
    %52 = arith.mulf %50, %51 : vector<16x128xf32>
    %53 = arith.addf %47, %52 : vector<16x128xf32>
    %54 = vector.extract_strided_slice %2 {offsets = [0, 3], sizes = [16, 1], strides = [1, 1]} : vector<16x16xf32> to vector<16x1xf32>
    %55 = vector.extract_strided_slice %32 {offsets = [3, 0], sizes = [1, 128], strides = [1, 1]} : vector<16x128xf32> to vector<1x128xf32>
    %56 = vector.broadcast %54 : vector<16x1xf32> to vector<16x128xf32>
    %57 = vector.broadcast %55 : vector<1x128xf32> to vector<16x128xf32>
    %58 = arith.mulf %56, %57 : vector<16x128xf32>
    %59 = arith.addf %53, %58 : vector<16x128xf32>
    %60 = vector.extract_strided_slice %2 {offsets = [0, 4], sizes = [16, 1], strides = [1, 1]} : vector<16x16xf32> to vector<16x1xf32>
    %61 = vector.extract_strided_slice %32 {offsets = [4, 0], sizes = [1, 128], strides = [1, 1]} : vector<16x128xf32> to vector<1x128xf32>
    %62 = vector.broadcast %60 : vector<16x1xf32> to vector<16x128xf32>
    %63 = vector.broadcast %61 : vector<1x128xf32> to vector<16x128xf32>
    %64 = arith.mulf %62, %63 : vector<16x128xf32>
    %65 = arith.addf %59, %64 : vector<16x128xf32>
    %66 = vector.extract_strided_slice %2 {offsets = [0, 5], sizes = [16, 1], strides = [1, 1]} : vector<16x16xf32> to vector<16x1xf32>
    %67 = vector.extract_strided_slice %32 {offsets = [5, 0], sizes = [1, 128], strides = [1, 1]} : vector<16x128xf32> to vector<1x128xf32>
    %68 = vector.broadcast %66 : vector<16x1xf32> to vector<16x128xf32>
    %69 = vector.broadcast %67 : vector<1x128xf32> to vector<16x128xf32>
    %70 = arith.mulf %68, %69 : vector<16x128xf32>
    %71 = arith.addf %65, %70 : vector<16x128xf32>
    %72 = vector.extract_strided_slice %2 {offsets = [0, 6], sizes = [16, 1], strides = [1, 1]} : vector<16x16xf32> to vector<16x1xf32>
    %73 = vector.extract_strided_slice %32 {offsets = [6, 0], sizes = [1, 128], strides = [1, 1]} : vector<16x128xf32> to vector<1x128xf32>
    %74 = vector.broadcast %72 : vector<16x1xf32> to vector<16x128xf32>
    %75 = vector.broadcast %73 : vector<1x128xf32> to vector<16x128xf32>
    %76 = arith.mulf %74, %75 : vector<16x128xf32>
    %77 = arith.addf %71, %76 : vector<16x128xf32>
    %78 = vector.extract_strided_slice %2 {offsets = [0, 7], sizes = [16, 1], strides = [1, 1]} : vector<16x16xf32> to vector<16x1xf32>
    %79 = vector.extract_strided_slice %32 {offsets = [7, 0], sizes = [1, 128], strides = [1, 1]} : vector<16x128xf32> to vector<1x128xf32>
    %80 = vector.broadcast %78 : vector<16x1xf32> to vector<16x128xf32>
    %81 = vector.broadcast %79 : vector<1x128xf32> to vector<16x128xf32>
    %82 = arith.mulf %80, %81 : vector<16x128xf32>
    %83 = arith.addf %77, %82 : vector<16x128xf32>
    %84 = vector.extract_strided_slice %2 {offsets = [0, 8], sizes = [16, 1], strides = [1, 1]} : vector<16x16xf32> to vector<16x1xf32>
    %85 = vector.extract_strided_slice %32 {offsets = [8, 0], sizes = [1, 128], strides = [1, 1]} : vector<16x128xf32> to vector<1x128xf32>
    %86 = vector.broadcast %84 : vector<16x1xf32> to vector<16x128xf32>
    %87 = vector.broadcast %85 : vector<1x128xf32> to vector<16x128xf32>
    %88 = arith.mulf %86, %87 : vector<16x128xf32>
    %89 = arith.addf %83, %88 : vector<16x128xf32>
    %90 = vector.extract_strided_slice %2 {offsets = [0, 9], sizes = [16, 1], strides = [1, 1]} : vector<16x16xf32> to vector<16x1xf32>
    %91 = vector.extract_strided_slice %32 {offsets = [9, 0], sizes = [1, 128], strides = [1, 1]} : vector<16x128xf32> to vector<1x128xf32>
    %92 = vector.broadcast %90 : vector<16x1xf32> to vector<16x128xf32>
    %93 = vector.broadcast %91 : vector<1x128xf32> to vector<16x128xf32>
    %94 = arith.mulf %92, %93 : vector<16x128xf32>
    %95 = arith.addf %89, %94 : vector<16x128xf32>
    %96 = vector.extract_strided_slice %2 {offsets = [0, 10], sizes = [16, 1], strides = [1, 1]} : vector<16x16xf32> to vector<16x1xf32>
    %97 = vector.extract_strided_slice %32 {offsets = [10, 0], sizes = [1, 128], strides = [1, 1]} : vector<16x128xf32> to vector<1x128xf32>
    %98 = vector.broadcast %96 : vector<16x1xf32> to vector<16x128xf32>
    %99 = vector.broadcast %97 : vector<1x128xf32> to vector<16x128xf32>
    %100 = arith.mulf %98, %99 : vector<16x128xf32>
    %101 = arith.addf %95, %100 : vector<16x128xf32>
    %102 = vector.extract_strided_slice %2 {offsets = [0, 11], sizes = [16, 1], strides = [1, 1]} : vector<16x16xf32> to vector<16x1xf32>
    %103 = vector.extract_strided_slice %32 {offsets = [11, 0], sizes = [1, 128], strides = [1, 1]} : vector<16x128xf32> to vector<1x128xf32>
    %104 = vector.broadcast %102 : vector<16x1xf32> to vector<16x128xf32>
    %105 = vector.broadcast %103 : vector<1x128xf32> to vector<16x128xf32>
    %106 = arith.mulf %104, %105 : vector<16x128xf32>
    %107 = arith.addf %101, %106 : vector<16x128xf32>
    %108 = vector.extract_strided_slice %2 {offsets = [0, 12], sizes = [16, 1], strides = [1, 1]} : vector<16x16xf32> to vector<16x1xf32>
    %109 = vector.extract_strided_slice %32 {offsets = [12, 0], sizes = [1, 128], strides = [1, 1]} : vector<16x128xf32> to vector<1x128xf32>
    %110 = vector.broadcast %108 : vector<16x1xf32> to vector<16x128xf32>
    %111 = vector.broadcast %109 : vector<1x128xf32> to vector<16x128xf32>
    %112 = arith.mulf %110, %111 : vector<16x128xf32>
    %113 = arith.addf %107, %112 : vector<16x128xf32>
    %114 = vector.extract_strided_slice %2 {offsets = [0, 13], sizes = [16, 1], strides = [1, 1]} : vector<16x16xf32> to vector<16x1xf32>
    %115 = vector.extract_strided_slice %32 {offsets = [13, 0], sizes = [1, 128], strides = [1, 1]} : vector<16x128xf32> to vector<1x128xf32>
    %116 = vector.broadcast %114 : vector<16x1xf32> to vector<16x128xf32>
    %117 = vector.broadcast %115 : vector<1x128xf32> to vector<16x128xf32>
    %118 = arith.mulf %116, %117 : vector<16x128xf32>
    %119 = arith.addf %113, %118 : vector<16x128xf32>
    %120 = vector.extract_strided_slice %2 {offsets = [0, 14], sizes = [16, 1], strides = [1, 1]} : vector<16x16xf32> to vector<16x1xf32>
    %121 = vector.extract_strided_slice %32 {offsets = [14, 0], sizes = [1, 128], strides = [1, 1]} : vector<16x128xf32> to vector<1x128xf32>
    %122 = vector.broadcast %120 : vector<16x1xf32> to vector<16x128xf32>
    %123 = vector.broadcast %121 : vector<1x128xf32> to vector<16x128xf32>
    %124 = arith.mulf %122, %123 : vector<16x128xf32>
    %125 = arith.addf %119, %124 : vector<16x128xf32>
    %126 = vector.extract_strided_slice %2 {offsets = [0, 15], sizes = [16, 1], strides = [1, 1]} : vector<16x16xf32> to vector<16x1xf32>
    %127 = vector.extract_strided_slice %32 {offsets = [15, 0], sizes = [1, 128], strides = [1, 1]} : vector<16x128xf32> to vector<1x128xf32>
    %128 = vector.broadcast %126 : vector<16x1xf32> to vector<16x128xf32>
    %129 = vector.broadcast %127 : vector<1x128xf32> to vector<16x128xf32>
    %130 = arith.mulf %128, %129 : vector<16x128xf32>
    %131 = arith.addf %125, %130 : vector<16x128xf32>
    %cst_11 = arith.constant 0.000000e+00 : f32
    %132 = vector.broadcast %cst_11 : f32 to vector<16x128xf32>
    %133 = arith.maximumf %131, %132 : vector<16x128xf32>
    %134 = vector.broadcast %3 : vector<16x1xf32> to vector<16x128xf32>
    %135 = arith.mulf %134, %133 : vector<16x128xf32>
    %cst_12 = arith.constant dense<0.000000e+00> : vector<128xf32>
    %136 = vector.multi_reduction <add>, %135, %cst_12 [0] : vector<16x128xf32> to vector<128xf32>
    %137 = vector.shape_cast %136 : vector<128xf32> to vector<1x128xf32>
    %c0_13 = arith.constant 0 : index
    %c0_14 = arith.constant 0 : index
    %138 = vector.load %arg7[%c0_13, %c0_14] : memref<1x1xf32, #tpu.memory_space<vmem>>, vector<1x1xf32>
    %139 = vector.broadcast %138 : vector<1x1xf32> to vector<1x128xf32>
    %140 = arith.addf %137, %139 : vector<1x128xf32>
    %c0_15 = arith.constant 0 : index
    %c0_16 = arith.constant 0 : index
    %141 = vector.load %arg8[%c0_15, %c0_16] : memref<1x128xf32, #tpu.memory_space<vmem>>, vector<1x128xf32>
    tpu.vector_store %arg8[%c0_15, %c0_16], %140 {strides = array<i32>} : memref<1x128xf32, #tpu.memory_space<vmem>>, vector<1x128xf32>,
    return
  }
  func.func @transform_0(%arg0: i32) -> (i32, i32) {
    %c0_i32 = arith.constant 0 : i32
    %c0_i32_0 = arith.constant 0 : i32
    return %c0_i32, %arg0 : i32, i32
  }
  func.func @transform_1(%arg0: i32) -> (i32, i32) {
    %c0_i32 = arith.constant 0 : i32
    %c0_i32_0 = arith.constant 0 : i32
    %c0_i32_1 = arith.constant 0 : i32
    return %c0_i32, %c0_i32_0 : i32, i32
  }
  func.func @transform_2(%arg0: i32) -> (i32, i32) {
    %c0_i32 = arith.constant 0 : i32
    %c0_i32_0 = arith.constant 0 : i32
    %c0_i32_1 = arith.constant 0 : i32
    return %c0_i32, %c0_i32_0 : i32, i32
  }
  func.func @transform_3(%arg0: i32) -> (i32, i32) {
    %c0_i32 = arith.constant 0 : i32
    %c0_i32_0 = arith.constant 0 : i32
    %c0_i32_1 = arith.constant 0 : i32
    return %c0_i32, %c0_i32_0 : i32, i32
  }
  func.func @transform_4(%arg0: i32) -> (i32, i32) {
    %c0_i32 = arith.constant 0 : i32
    %c0_i32_0 = arith.constant 0 : i32
    %c0_i32_1 = arith.constant 0 : i32
    return %c0_i32, %c0_i32_0 : i32, i32
  }
  func.func @transform_5(%arg0: i32) -> (i32, i32) {
    %c0_i32 = arith.constant 0 : i32
    %c0_i32_0 = arith.constant 0 : i32
    %c0_i32_1 = arith.constant 0 : i32
    return %c0_i32, %c0_i32_0 : i32, i32
  }
  func.func @transform_6(%arg0: i32) -> (i32, i32) {
    %c0_i32 = arith.constant 0 : i32
    %c0_i32_0 = arith.constant 0 : i32
    %c0_i32_1 = arith.constant 0 : i32
    return %c0_i32, %c0_i32_0 : i32, i32
  }
  func.func @transform_7(%arg0: i32) -> (i32, i32) {
    %c0_i32 = arith.constant 0 : i32
    %c0_i32_0 = arith.constant 0 : i32
    return %c0_i32, %arg0 : i32, i32
  }
}

</mosaic_0001>

<bundles_post_ra>
// kernel: value_network_forward.1
= control target key start
LH: loop header
LB: loop body
LE: loop exit
PB: predicated region body
PF: predicated region fallthrough
CT: control target
= control target key end

     0   :  { %v416_v0 = vmov 1   ;;  %v417_v1 = vmov 0   ;;  %v418_v7 = vmov 3   ;;  %v419_v8 = vmov 2   ;;  %s574_s2 = inlined_call_operand.vmem [shape: f32[16,1], index: 2, kind: input, shape index: {}]   ;;  %s575_s1 = inlined_call_operand.vmem [shape: f32[16,4], index: 1, kind: input, shape index: {}]   ;;  %s576_s4 = inlined_call_operand.vmem [shape: f32[16,1], index: 4, kind: input, shape index: {}]   ;;  %s577_s3 = inlined_call_operand.vmem [shape: f32[16,16], index: 3, kind: input, shape index: {}]   ;;  %s578_s0 = inlined_call_operand.vmem [shape: f32[4,128], index: 0, kind: input, shape index: {}]   ;;  %s579_s6 = inlined_call_operand.<no memory space> [shape: f32[1,1], index: 6, kind: input, shape index: {}]   ;;  %s580_s5 = inlined_call_operand.vmem [shape: f32[16,1], index: 5, kind: input, shape index: {}]   ;;  %s581_s7 = inlined_call_operand.vmem [shape: f32[1,128], index: 7, kind: output, shape index: {}]  }
   0x1   :  { %377 = vset.pattern.permute.xlu2 %v416_v0  ;;  %376 = vset.pattern.permute.xlu1 %v417_v1  ;;  %v35_v2 = vld [vmem:[%s574_s2] sm:$0xff]  ;;  %v30_v4 = vld [vmem:[%s575_s1 + $0x8] sm:$0xff]  ;;  %v420_v12 = vmov 4   ;;  %v421_v13 = vmov 7   ;;  %v422_v14 = vmov 9   ;;  %v423_v15 = vmov 12  }
   0x2   :  { %v29_v3 = vld [vmem:[%s575_s1] sm:$0xff]  ;;  %375 = vset.pattern.permute.xlu0 %v417_v1  ;;  %v36_v5 = vld [vmem:[%s574_s2 + $0x8] sm:$0xff]  ;;  %v424_v16 = vmov 5   ;;  %v425_v17 = vmov 14   ;;  %v426_v18 = vmov 6   ;;  %v427_v19 = vmov 8  }
   0x3   :  { %63 = vperm.xlu2 %377, %v29_v3   ;;  %39 = vperm.xlu0 %375, %v35_v2   ;;  %v104_v6 = vld [vmem:[%s576_s4 + $0x8] sm:$0xff]  ;;  %v103_v9 = vld [vmem:[%s576_s4] sm:$0xff]  ;;  %v428_v22 = vmov 10   ;;  %v429_v27 = vmov 11   ;;  %v430_v38 = vmov 13   ;;  %v12_v42 = vstv %s579_s6 }
   0x4   :  { %49 = vperm.xlu1 %376, %v29_v3   ;;  %v496_v10 = vld [vmem:[%s577_s3] sm:$0xff]  ;;  %v501_v11 = vld [vmem:[%s577_s3 + $0x8] sm:$0xff]  ;;  %13 = vst [vmem:[#allocation2] sm:$0x1] %v12_v42  ;;  %v431_v55 = vmov 15  }
   0x5   :  { %v28_v24 = vld [vmem:[%s578_s0] sm:$0xf] }
   0x6   :  { %v70_v25 = vperm.slane %v28_v24, 1  ;;  %v57_v26 = vperm.slane %v28_v24, 0  ;;  %v83_v44 = vperm.slane %v28_v24, 2  ;;  %v96_v51 = vperm.slane %v28_v24, 3 }
   0xb   :  { %67 = vperm.xlu2 %377, %v30_v4   ;;  %44 = vperm.xlu0 %375, %v36_v5   ;;  %v346_v49 = vld [vmem:[#allocation2] sm:$0x1] }
   0xc   :  { %54 = vperm.xlu1 %376, %v30_v4   ;;  %v33_v5 = vld [vmem:[%s580_s5] sm:$0xff] }
  0x13   :  { %379 = vset.pattern.permute.xlu2 %v418_v7  ;;  %112 = vperm.xlu0 %375, %v104_v6  }
  0x14   :  { %378 = vset.pattern.permute.xlu1 %v419_v8  ;;  %89 = vperm.xlu2 %379, %v29_v3  }
  0x15   :  { %80 = vperm.xlu1 %378, %v30_v4  }
  0x1b   :  { %382 = vset.pattern.permute.xlu0 %v419_v8 }
  0x1c   :  { %76 = vperm.xlu0 %382, %v29_v3   ;;  %381 = vset.pattern.permute.xlu2 %v417_v1 }
  0x1d   :  { %380 = vset.pattern.permute.xlu1 %v418_v7  ;;  %107 = vperm.xlu2 %381, %v103_v9  }
  0x1e   :  { %93 = vperm.xlu1 %380, %v30_v4  }
  0x24   :  { %144 = vperm.xlu0 %382, %v496_v10  }
  0x25   :  { %122 = vperm.xlu2 %381, %v501_v11  }
  0x26   :  { %383 = vset.pattern.permute.xlu1 %v417_v1 }
  0x27   :  { %117 = vperm.xlu1 %383, %v496_v10  }
  0x2c   :  { %390 = vset.pattern.permute.xlu0 %v420_v12 }
  0x2d   :  { %174 = vperm.xlu0 %390, %v501_v11   ;;  %385 = vset.pattern.permute.xlu2 %v416_v0 }
  0x2e   :  { %135 = vperm.xlu2 %385, %v501_v11  }
  0x2f   :  { %384 = vset.pattern.permute.xlu1 %v416_v0  ;;  %v34_v0 = vld [vmem:[%s580_s5 + $0x8] sm:$0xff] }
  0x30   :  { %131 = vperm.xlu1 %384, %v496_v10  }
  0x35   :  { %395 = vset.pattern.permute.xlu0 %v421_v13 }
  0x36   :  { %209 = vperm.xlu0 %395, %v496_v10   ;;  %387 = vset.pattern.permute.xlu2 %v418_v7 }
  0x37   :  { %157 = vperm.xlu2 %387, %v496_v10  }
  0x38   :  { %386 = vset.pattern.permute.xlu1 %v419_v8 }
  0x39   :  { %148 = vperm.xlu1 %386, %v501_v11  }
  0x3e   :  { %400 = vset.pattern.permute.xlu0 %v422_v14 }
  0x3f   :  { %239 = vperm.xlu0 %400, %v501_v11   ;;  %389 = vset.pattern.permute.xlu2 %v420_v12 }
  0x40   :  { %170 = vperm.xlu2 %389, %v496_v10  }
  0x41   :  { %388 = vset.pattern.permute.xlu1 %v418_v7 }
  0x42   :  { %161 = vperm.xlu1 %388, %v501_v11  }
  0x47   :  { %405 = vset.pattern.permute.xlu0 %v423_v15 }
  0x48   :  { %274 = vperm.xlu0 %405, %v496_v10   ;;  %392 = vset.pattern.permute.xlu2 %v424_v16 }
  0x49   :  { %187 = vperm.xlu2 %392, %v501_v11  }
  0x4a   :  { %391 = vset.pattern.permute.xlu1 %v424_v16 }
  0x4b   :  { %183 = vperm.xlu1 %391, %v496_v10  }
  0x50   :  { %410 = vset.pattern.permute.xlu0 %v425_v17 }
  0x51   :  { %304 = vperm.xlu0 %410, %v501_v11   ;;  %394 = vset.pattern.permute.xlu2 %v426_v18 }
  0x52   :  { %200 = vperm.xlu2 %394, %v501_v11  }
  0x53   :  { %393 = vset.pattern.permute.xlu1 %v426_v18 }
  0x54   :  { %196 = vperm.xlu1 %393, %v496_v10  }
  0x59   :  { %415 = vset.pattern.permute.xlu0 %v417_v1 }
  0x5a   :  { %397 = vset.pattern.permute.xlu2 %v427_v19  ;;  %349 = vperm.xlu0 %415, %v346_v49  }
  0x5b   :  { %222 = vperm.xlu2 %397, %v496_v10  }
  0x5c   :  { %396 = vset.pattern.permute.xlu1 %v421_v13 }
  0x5d   :  { %v64_v20 = vpop.permute.xlu2 %63  ;;  %213 = vperm.xlu1 %396, %v501_v11  }
  0x5e   :  { %v71_v30 = vmul.f32 %v70_v25, %v64_v20 }
  0x63   :  { %399 = vset.pattern.permute.xlu2 %v422_v14 }
  0x64   :  { %235 = vperm.xlu2 %399, %v496_v10  }
  0x65   :  { %v68_v21 = vpop.permute.xlu2 %67  ;;  %398 = vset.pattern.permute.xlu1 %v427_v19 }
  0x66   :  { %226 = vperm.xlu1 %398, %v501_v11   ;;  %v72_v39 = vmul.f32 %v70_v25, %v68_v21 }
  0x6c   :  { %402 = vset.pattern.permute.xlu2 %v428_v22 }
  0x6d   :  { %252 = vperm.xlu2 %402, %v501_v11  }
  0x6e   :  { %401 = vset.pattern.permute.xlu1 %v428_v22  ;;  %v90_v23 = vpop.permute.xlu2 %89 }
  0x6f   :  { %248 = vperm.xlu1 %401, %v496_v10   ;;  %v97_v56 = vmul.f32 %v96_v51, %v90_v23 }
  0x75   :  { %404 = vset.pattern.permute.xlu2 %v429_v27  ;;  %v40_v29 = vpop.permute.xlu0 %39 }
  0x76   :  { %v50_v28 = vpop.permute.xlu1 %49  ;;  %265 = vperm.xlu2 %404, %v501_v11  }
  0x77   :  { %v58_v31 = vmul.f32 %v57_v26, %v50_v28  ;;  %403 = vset.pattern.permute.xlu1 %v429_v27  ;;  %v108_v32 = vpop.permute.xlu2 %107 }
  0x78   :  { %261 = vperm.xlu1 %403, %v496_v10  }
  0x79   :  { %v60_v33 = vadd.f32 %v58_v31, %v40_v29 }
  0x7b   :  { %v73_v34 = vadd.f32 %v71_v30, %v60_v33 }
  0x7d   :  { %v45_v36 = vpop.permute.xlu0 %44 }
  0x7e   :  { %v55_v35 = vpop.permute.xlu1 %54  ;;  %407 = vset.pattern.permute.xlu2 %v430_v38 }
  0x7f   :  { %v59_v37 = vmul.f32 %v57_v26, %v55_v35  ;;  %287 = vperm.xlu2 %407, %v496_v10   ;;  %v123_v41 = vpop.permute.xlu2 %122 }
  0x80   :  { %406 = vset.pattern.permute.xlu1 %v423_v15 }
  0x81   :  { %v61_v40 = vadd.f32 %v59_v37, %v45_v36  ;;  %278 = vperm.xlu1 %406, %v501_v11  }
  0x83   :  { %v74_v43 = vadd.f32 %v72_v39, %v61_v40 }
  0x85   :  { %v113_v45 = vpop.permute.xlu0 %112 }
  0x87   :  { %v81_v46 = vpop.permute.xlu1 %80  ;;  %409 = vset.pattern.permute.xlu2 %v425_v17 }
  0x88   :  { %v85_v47 = vmul.f32 %v83_v44, %v81_v46  ;;  %300 = vperm.xlu2 %409, %v496_v10   ;;  %v136_v50 = vpop.permute.xlu2 %135 }
  0x89   :  { %408 = vset.pattern.permute.xlu1 %v430_v38 }
  0x8a   :  { %v87_v48 = vadd.f32 %v85_v47, %v74_v43  ;;  %291 = vperm.xlu1 %408, %v501_v11  }
  0x8e   :  { %v77_v52 = vpop.permute.xlu0 %76 }
  0x8f   :  { %v84_v53 = vmul.f32 %v83_v44, %v77_v52 }
  0x90   :  { %v94_v54 = vpop.permute.xlu1 %93  ;;  %412 = vset.pattern.permute.xlu2 %v431_v55 }
  0x91   :  { %v86_v57 = vadd.f32 %v84_v53, %v73_v34  ;;  %v98_v58 = vmul.f32 %v96_v51, %v94_v54  ;;  %317 = vperm.xlu2 %412, %v501_v11   ;;  %v158_v61 = vpop.permute.xlu2 %157 }
  0x92   :  { %411 = vset.pattern.permute.xlu1 %v431_v55 }
  0x93   :  { %v99_v59 = vadd.f32 %v97_v56, %v86_v57  ;;  %v100_v60 = vadd.f32 %v98_v58, %v87_v48  ;;  %313 = vperm.xlu1 %411, %v496_v10  }
  0x95   :  { %v543_v62 = vmax.f32 %v99_v59, 0.0 }
  0x96   :  { %v145_v13 = vpop.permute.xlu0 %144 }
  0x97   :  { %v125_v63 = vperm.slane %v543_v62, 0  ;;  %v138_v2 = vperm.slane %v543_v62, 1  ;;  %v151_v12 = vperm.slane %v543_v62, 2  ;;  %v164_v15 = vperm.slane %v543_v62, 3 }
  0x98   :  { %v177_v20 = vperm.slane %v543_v62, 4  ;;  %v190_v33 = vperm.slane %v543_v62, 5  ;;  %v203_v36 = vperm.slane %v543_v62, 6  ;;  %v216_v49 = vperm.slane %v543_v62, 7 }
  0x99   :  { %v118_v3 = vpop.permute.xlu1 %117  ;;  %v127_v4 = vmul.f32 %v125_v63, %v123_v41  ;;  %414 = vset.pattern.permute.xlu2 %v417_v1  ;;  %v140_v7 = vmul.f32 %v138_v2, %v136_v50  ;;  %v152_v17 = vmul.f32 %v151_v12, %v145_v13  ;;  %v165_v19 = vmul.f32 %v164_v15, %v158_v61 }
  0x9a   :  { %v126_v6 = vmul.f32 %v125_v63, %v118_v3  ;;  %334 = vperm.xlu2 %414, %v34_v0   ;;  %v171_v11 = vpop.permute.xlu2 %170 }
  0x9b   :  { %413 = vset.pattern.permute.xlu1 %v417_v1  ;;  %v129_v8 = vadd.f32 %v127_v4, %v113_v45  ;;  %v178_v22 = vmul.f32 %v177_v20, %v171_v11  ;;  %v560_v45 = vmax.f32 %v100_v60, 0.0 }
  0x9c   :  { %v128_v9 = vadd.f32 %v126_v6, %v108_v32  ;;  %329 = vperm.xlu1 %413, %v33_v5  }
  0x9d   :  { %v142_v10 = vadd.f32 %v140_v7, %v129_v8  ;;  %v229_v52 = vperm.slane %v560_v45, 0  ;;  %v242_v54 = vperm.slane %v560_v45, 1  ;;  %v255_v6 = vperm.slane %v560_v45, 2 }
  0x9f   :  { %v175_v29 = vpop.permute.xlu0 %174 }
  0xa0   :  { %v179_v32 = vmul.f32 %v177_v20, %v175_v29  ;;  %v281_v20 = vperm.slane %v560_v45, 4 }
  0xa2   :  { %v132_v14 = vpop.permute.xlu1 %131 }
  0xa3   :  { %v139_v16 = vmul.f32 %v138_v2, %v132_v14  ;;  %v188_v1 = vpop.permute.xlu2 %187 }
  0xa4   :  { %v192_v35 = vmul.f32 %v190_v33, %v188_v1 }
  0xa5   :  { %v141_v18 = vadd.f32 %v139_v16, %v128_v9  ;;  %v268_v9 = vperm.slane %v560_v45, 3 }
  0xa7   :  { %v154_v21 = vadd.f32 %v152_v17, %v141_v18 }
  0xa8   :  { %v210_v46 = vpop.permute.xlu0 %209 }
  0xa9   :  { %v167_v23 = vadd.f32 %v165_v19, %v154_v21  ;;  %v217_v51 = vmul.f32 %v216_v49, %v210_v46 }
  0xab   :  { %v149_v24 = vpop.permute.xlu1 %148  ;;  %v180_v25 = vadd.f32 %v178_v22, %v167_v23  ;;  %v294_v22 = vperm.slane %v560_v45, 5 }
  0xac   :  { %v153_v26 = vmul.f32 %v151_v12, %v149_v24  ;;  %v201_v28 = vpop.permute.xlu2 %200 }
  0xad   :  { %v205_v38 = vmul.f32 %v203_v36, %v201_v28 }
  0xae   :  { %v155_v27 = vadd.f32 %v153_v26, %v142_v10 }
  0xb1   :  { %v240_v2 = vpop.permute.xlu0 %239 }
  0xb2   :  { %v244_v5 = vmul.f32 %v242_v54, %v240_v2 }
  0xb4   :  { %v162_v30 = vpop.permute.xlu1 %161 }
  0xb5   :  { %v166_v31 = vmul.f32 %v164_v15, %v162_v30  ;;  %v223_v40 = vpop.permute.xlu2 %222 }
  0xb6   :  { %v230_v55 = vmul.f32 %v229_v52, %v223_v40 }
  0xb7   :  { %v168_v34 = vadd.f32 %v166_v31, %v155_v27 }
  0xb9   :  { %v181_v37 = vadd.f32 %v179_v32, %v168_v34 }
  0xba   :  { %v275_v18 = vpop.permute.xlu0 %274 }
  0xbb   :  { %v194_v39 = vadd.f32 %v192_v35, %v181_v37  ;;  %v282_v1 = vmul.f32 %v281_v20, %v275_v18 }
  0xbd   :  { %v184_v41 = vpop.permute.xlu1 %183  ;;  %v207_v42 = vadd.f32 %v205_v38, %v194_v39  ;;  %v320_v39 = vperm.slane %v560_v45, 7 }
  0xbe   :  { %v191_v43 = vmul.f32 %v190_v33, %v184_v41  ;;  %v236_v47 = vpop.permute.xlu2 %235 }
  0xbf   :  { %v243_v57 = vmul.f32 %v242_v54, %v236_v47 }
  0xc0   :  { %v193_v44 = vadd.f32 %v191_v43, %v180_v25  ;;  %v307_v25 = vperm.slane %v560_v45, 6 }
  0xc3   :  { %v305_v34 = vpop.permute.xlu0 %304 }
  0xc4   :  { %v309_v38 = vmul.f32 %v307_v25, %v305_v34 }
  0xc6   :  { %v197_v48 = vpop.permute.xlu1 %196 }
  0xc7   :  { %v204_v50 = vmul.f32 %v203_v36, %v197_v48  ;;  %v253_v60 = vpop.permute.xlu2 %252 }
  0xc8   :  { %v257_v8 = vmul.f32 %v255_v6, %v253_v60 }
  0xc9   :  { %v206_v53 = vadd.f32 %v204_v50, %v193_v44 }
  0xcb   :  { %v219_v56 = vadd.f32 %v217_v51, %v206_v53 }
  0xcd   :  { %v232_v58 = vadd.f32 %v230_v55, %v219_v56 }
  0xcf   :  { %v214_v59 = vpop.permute.xlu1 %213  ;;  %v245_v61 = vadd.f32 %v243_v57, %v232_v58  ;;  %v350_v58 = vpop.permute.xlu0 %349 }
  0xd0   :  { %v218_v63 = vmul.f32 %v216_v49, %v214_v59  ;;  %v266_v62 = vpop.permute.xlu2 %265 }
  0xd1   :  { %v270_v11 = vmul.f32 %v268_v9, %v266_v62 }
  0xd2   :  { %v220_v0 = vadd.f32 %v218_v63, %v207_v42 }
  0xd8   :  { %v227_v3 = vpop.permute.xlu1 %226 }
  0xd9   :  { %v231_v4 = vmul.f32 %v229_v52, %v227_v3  ;;  %v288_v16 = vpop.permute.xlu2 %287 }
  0xda   :  { %v295_v26 = vmul.f32 %v294_v22, %v288_v16 }
  0xdb   :  { %v233_v7 = vadd.f32 %v231_v4, %v220_v0 }
  0xdd   :  { %v246_v10 = vadd.f32 %v244_v5, %v233_v7 }
  0xdf   :  { %v259_v12 = vadd.f32 %v257_v8, %v246_v10 }
  0xe1   :  { %v249_v13 = vpop.permute.xlu1 %248  ;;  %v272_v14 = vadd.f32 %v270_v11, %v259_v12 }
  0xe2   :  { %v256_v15 = vmul.f32 %v255_v6, %v249_v13  ;;  %v301_v24 = vpop.permute.xlu2 %300 }
  0xe3   :  { %v308_v28 = vmul.f32 %v307_v25, %v301_v24 }
  0xe4   :  { %v258_v17 = vadd.f32 %v256_v15, %v245_v61  ;;  %v352_v61 = vperm.slane %v350_v58, 0 }
  0xea   :  { %v262_v19 = vpop.permute.xlu1 %261 }
  0xeb   :  { %v269_v21 = vmul.f32 %v268_v9, %v262_v19  ;;  %v318_v37 = vpop.permute.xlu2 %317 }
  0xec   :  { %v322_v41 = vmul.f32 %v320_v39, %v318_v37 }
  0xed   :  { %v271_v23 = vadd.f32 %v269_v21, %v258_v17 }
  0xef   :  { %v284_v27 = vadd.f32 %v282_v1, %v271_v23 }
  0xf1   :  { %v297_v29 = vadd.f32 %v295_v26, %v284_v27 }
  0xf3   :  { %v279_v30 = vpop.permute.xlu1 %278  ;;  %v310_v31 = vadd.f32 %v308_v28, %v297_v29 }
  0xf4   :  { %v283_v32 = vmul.f32 %v281_v20, %v279_v30  ;;  %v335_v49 = vpop.permute.xlu2 %334 }
  0xf6   :  { %v285_v33 = vadd.f32 %v283_v32, %v272_v14 }
  0xfc   :  { %v292_v35 = vpop.permute.xlu1 %291 }
  0xfd   :  { %v296_v36 = vmul.f32 %v294_v22, %v292_v35 }
  0xff   :  { %v298_v40 = vadd.f32 %v296_v36, %v285_v33 }
 0x101   :  { %v311_v42 = vadd.f32 %v309_v38, %v298_v40 }
 0x103   :  { %v324_v43 = vadd.f32 %v322_v41, %v311_v42 }
 0x105   :  { %v314_v44 = vpop.permute.xlu1 %313  ;;  %v326_v48 = vmax.f32 %v324_v43, 0.0 }
 0x106   :  { %v321_v46 = vmul.f32 %v320_v39, %v314_v44 }
 0x107   :  { %v338_v52 = vmul.f32 %v335_v49, %v326_v48 }
 0x108   :  { %v323_v47 = vadd.f32 %v321_v46, %v310_v31 }
 0x10a   :  { %v325_v50 = vmax.f32 %v323_v47, 0.0 }
 0x10e   :  { %v330_v51 = vpop.permute.xlu1 %329 }
 0x10f   :  { %v337_v53 = vmul.f32 %v330_v51, %v325_v50 }
 0x111   :  { %v339_v54 = vadd.f32 %v338_v52, %v337_v53 }
 0x113   :  { %v340_v55 = vrot.slane %v339_v54, 4 }
 0x115   :  { %v341_v56 = vadd.f32 %v340_v55, %v339_v54 }
 0x117   :  { %v342_v57 = vrot.slane %v341_v56, 2 }
 0x119   :  { %v343_v59 = vadd.f32 %v342_v57, %v341_v56 }
 0x11b   :  { %v344_v45 = vrot.slane %v343_v59, 1 }
 0x11d   :  { %v345_v60 = vadd.f32 %v344_v45, %v343_v59 }
 0x11f   :  { %v353_v63 = vadd.f32 %v352_v61, %v345_v60 }
 0x121   :  { %354 = vst [vmem:[%s581_s7] sm:$0x1] %v353_v63 }

</bundles_post_ra>
